<compile_context>
chip_gen: v7x
topology: tpu7x:2x2x1
jax: 0.10.0
libtpu: 0.0.40
codegen_flags: <defaults>
</compile_context>

<pallas_src>
import jax
import jax.numpy as jnp
from jax import lax
from jax.experimental import pallas as pl
from jax.experimental.pallas import tpu as pltpu


def _round_up(v, m):
    return ((v + m - 1) // m) * m


def _cdiv(a, b):
    return (a + b - 1) // b


def _default_num_core_splits():
    """2-way grid split only pays off on v7x (2 TensorCores per chip)."""
    try:
        kind = jax.devices()[0].device_kind.lower()
    except Exception:
        return 1
    return 2 if ("v7" in kind or "tpu7" in kind) else 1


def _sa_core_kernel(off_ref, lo_ref, hi_ref,           # SMEM: row offsets, per-tile seg range
                    x_ref, pos_ref,                     # (TN, C) f32 / (TN, 3) f32
                    w1x_ref, w1p_ref, b1_ref,           # (C, H1p) bf16 / (3, H1p) bf16 / (1, H1p) f32
                    w2_ref, b2_ref,                     # (H1p, Fp) bf16 (BN1 folded) / (1, Fp) f32
                    s2_ref, t2_ref,                     # (1, Fp) f32 BN2 eval-mode affine
                    out_ref):                           # (OUT_ROWS, Fp) f32 resident running max
    t = pl.program_id(1)

    @pl.when(t == 0)
    def _init():
        out_ref[...] = jnp.full(out_ref.shape, -jnp.inf, dtype=out_ref.dtype)

    # --- fused MLP (bf16 MXU inputs, f32 accumulation, f32 elementwise) --------------------
    h = jnp.dot(x_ref[...].astype(jnp.bfloat16), w1x_ref[...],
                preferred_element_type=jnp.float32)
    h = h + jnp.dot(pos_ref[...].astype(jnp.bfloat16), w1p_ref[...],
                    preferred_element_type=jnp.float32)
    h = jnp.maximum(h + b1_ref[...], 0.0)                        # Lin1 + ReLU (BN1 folded away)
    h = jnp.dot(h.astype(w2_ref.dtype), w2_ref[...], preferred_element_type=jnp.float32)
    h = jnp.maximum(h + b2_ref[...], 0.0)                        # Lin2 + ReLU
    h = h * s2_ref[...] + t2_ref[...]                            # BN2 eval-mode affine (TN, Fp)

    # --- segmented max over ONLY the segments overlapping this tile ------------------------
    tile_n = x_ref.shape[0]
    tile_id = pl.program_id(0) * pl.num_programs(1) + t
    tile_start = tile_id * tile_n
    row_idx = tile_start + lax.broadcasted_iota(jnp.int32, (tile_n, 1), 0)
    out_row = lax.broadcasted_iota(jnp.int32, (out_ref.shape[0], 1), 0)
    neg_inf = jnp.float32(-jnp.inf)

    def seg_body(b, acc):
        in_seg = (row_idx >= off_ref[b]) & (row_idx < off_ref[b + 1])
        seg_max = jnp.max(jnp.where(in_seg, h, neg_inf), axis=0, keepdims=True)   # (1, Fp)
        return jnp.where(out_row == b, jnp.maximum(acc, seg_max), acc)

    out_ref[...] = lax.fori_loop(lo_ref[tile_id], hi_ref[tile_id], seg_body, out_ref[...])


def _prepare_params(params, c):
    """Split W1 into x/pos parts, fold BN1's eval-mode affine into linear-2, pad lane-dense."""
    w1, b1, s1, t1, w2, b2, s2, t2 = params
    cin, h1 = w1.shape
    _, f = w2.shape
    # (relu(x@W1+b1)*s1 + t1) @ W2 + b2 == relu(x@W1+b1) @ (s1.T*W2) + (t1@W2 + b2)
    w2f = w2 * s1.reshape(h1, 1)
    b2f = t1 @ w2 + b2
    h1p = _round_up(h1, 128)      # lane-dense hidden; padded cols compute exact zeros
    fp = _round_up(f, 128)        # lane-dense output; padded cols sliced off in the wrapper
    w1x = jnp.zeros((c, h1p), jnp.float32).at[:, :h1].set(w1[:c])
    w1p = jnp.zeros((cin - c, h1p), jnp.float32).at[:, :h1].set(w1[c:])
    b1p = jnp.zeros((1, h1p), jnp.float32).at[:, :h1].set(b1)
    w2p = jnp.zeros((h1p, fp), jnp.float32).at[:h1, :f].set(w2f)
    b2p = jnp.zeros((1, fp), jnp.float32).at[:, :f].set(b2f)
    s2p = jnp.zeros((1, fp), jnp.float32).at[:, :f].set(s2)
    t2p = jnp.zeros((1, fp), jnp.float32).at[:, :f].set(t2)
    return (w1x.astype(jnp.bfloat16), w1p.astype(jnp.bfloat16), b1p,
            w2p.astype(jnp.bfloat16), b2p, s2p, t2p)


def sa_module_core(x, pos, batch, params, num_batches, *, tile_n=2048, num_core_splits=None):
    """Fused shared-MLP + per-graph max aggregation. Returns (pooled, pos_out, batch_out)."""
    n, c = x.shape
    f = params[4].shape[1]
    if num_core_splits is None:
        num_core_splits = _default_num_core_splits()

    w1x, w1p, b1p, w2p, b2p, s2p, t2p = _prepare_params(params, c)
    h1p = w1x.shape[1]
    fp = w2p.shape[1]
    out_rows = max(8, _round_up(num_batches, 8))     # full 8-sublane accumulator slab

    # Row tiling: no wrapper-side copy/pad of x/pos. Partial last blocks are fine: any row index
    # >= n falls outside every segment [off[b], off[b+1]) so garbage-padded rows never contribute.
    tile_n_eff = max(8, min(tile_n, _round_up(n, 8)))
    nrb = _cdiv(n, tile_n_eff)                       # real row blocks
    tiles_per_split = _cdiv(nrb, num_core_splits)
    total_tiles = num_core_splits * tiles_per_split

    # Per-graph row offsets (batch ids sorted, as torch_geometric guarantees) + per-tile segment
    # ranges, all scalar-prefetched into SMEM.
    offsets = jnp.searchsorted(batch.astype(jnp.int32),
                               jnp.arange(num_batches + 1, dtype=jnp.int32)).astype(jnp.int32)
    tile_starts = jnp.arange(total_tiles, dtype=jnp.int32) * tile_n_eff
    seg_lo = jnp.searchsorted(offsets[1:], tile_starts, side='right').astype(jnp.int32)
    seg_hi = jnp.searchsorted(offsets[:num_batches], tile_starts + tile_n_eff,
                              side='left').astype(jnp.int32)

    def row_map(c_, t_, *_):
        # Clamp so the (rare) padding tiles of a core split re-read the last real block; their
        # segment range [lo, hi) is empty, so they contribute nothing.
        return (jnp.minimum(c_ * tiles_per_split + t_, nrb - 1), 0)

    const = lambda c_, t_, *_: (0, 0)    # weights: constant block index -> resident, no re-DMA

    out3 = pl.pallas_call(
        _sa_core_kernel,
        out_shape=jax.ShapeDtypeStruct((num_core_splits, out_rows, fp), jnp.float32),
        grid_spec=pltpu.PrefetchScalarGridSpec(
            num_scalar_prefetch=3,
            grid=(num_core_splits, tiles_per_split),
            in_specs=[
                pl.BlockSpec((tile_n_eff, c), row_map),   # x   (f32 in HBM, bf16 cast in-kernel)
                pl.BlockSpec((tile_n_eff, 3), row_map),   # pos
                pl.BlockSpec((c, h1p), const),
                pl.BlockSpec((3, h1p), const),
                pl.BlockSpec((1, h1p), const),
                pl.BlockSpec((h1p, fp), const),
                pl.BlockSpec((1, fp), const),
                pl.BlockSpec((1, fp), const),
                pl.BlockSpec((1, fp), const),
            ],
            out_specs=pl.BlockSpec((None, out_rows, fp), lambda c_, t_, *_: (c_, 0, 0)),
        ),
        compiler_params=pltpu.CompilerParams(
            dimension_semantics=("parallel", "arbitrary"),   # c: 2-TC split (v7x); t: reduction
            vmem_limit_bytes=32 * 1024 * 1024),
    )(offsets, seg_lo, seg_hi, x, pos, w1x, w1p, b1p, w2p, b2p, s2p, t2p)

    pooled = jnp.max(out3, axis=0)[:num_batches, :f]   # combine core splits, drop padding
    # Empty graphs (no rows) yield -inf rows, same as previous versions.
    pos_out = jnp.zeros((num_batches, pos.shape[1]), dtype=pos.dtype)
    batch_out = jnp.arange(num_batches, dtype=batch.dtype)
    return pooled, pos_out, batch_out


# ------------------------------- references for self-check ---------------------------------
def _segment_max(h, batch, num_batches):
    rows = []
    for b in range(num_batches):
        rows.append(jnp.max(jnp.where((batch == b)[:, None], h, -jnp.inf), axis=0))
    return jnp.stack(rows, axis=0)


def _reference_f32(x, pos, batch, params, num_batches):
    """Unfolded float32 reference of the original math."""
    w1, b1, s1, t1, w2, b2, s2, t2 = params
    h = jnp.concatenate([x, pos], axis=1)
    h = jnp.maximum(h @ w1 + b1, 0.0) * s1 + t1
    h = jnp.maximum(h @ w2 + b2, 0.0) * s2 + t2
    return _segment_max(h, batch, num_batches)


def _reference_mirrored(x, pos, batch, params, num_batches):
    """Reference mirroring the kernel's exact numerics (split W1, BN1 fold, bf16 MXU inputs)."""
    c = x.shape[1]
    w1x, w1p, b1p, w2p, b2p, s2p, t2p = _prepare_params(params, c)
    f = params[4].shape[1]
    h = (jnp.dot(x.astype(jnp.bfloat16), w1x, preferred_element_type=jnp.float32)
         + jnp.dot(pos.astype(jnp.bfloat16), w1p, preferred_element_type=jnp.float32))
    h = jnp.maximum(h + b1p, 0.0)
    h = jnp.maximum(jnp.dot(h.astype(jnp.bfloat16), w2p,
                            preferred_element_type=jnp.float32) + b2p, 0.0)
    h = h * s2p + t2p
    return _segment_max(h, batch, num_batches)[:, :f]


if __name__ == "__main__":
    key = jax.random.PRNGKey(0)
    N, C, B = 64, 13, 2            # 64 points, 13 point features, 2 graphs in the batch
    IN, H1, F = C + 3, 64, 128     # nn = MLP([C+3, 64, 128])

    k = jax.random.split(key, 8)
    x = jax.random.normal(k[0], (N, C), dtype=jnp.float32)
    pos = jax.random.normal(k[1], (N, 3), dtype=jnp.float32)
    batch = jnp.concatenate([jnp.zeros((30,), jnp.int32),
                             jnp.ones((34,), jnp.int32)])   # sorted, as PyG guarantees

    w1 = jax.random.normal(k[2], (IN, H1), dtype=jnp.float32) * 0.1
    b1 = jax.random.normal(k[3], (1, H1), dtype=jnp.float32) * 0.1
    w2 = jax.random.normal(k[4], (H1, F), dtype=jnp.float32) * 0.1
    b2 = jax.random.normal(k[5], (1, F), dtype=jnp.float32) * 0.1
    g1 = 1.0 + 0.1 * jax.random.normal(k[6], (1, H1), dtype=jnp.float32)
    be1 = jnp.zeros((1, H1), jnp.float32)
    g2 = 1.0 + 0.1 * jax.random.normal(k[7], (1, F), dtype=jnp.float32)
    be2 = jnp.zeros((1, F), jnp.float32)
    eps = 1e-5
    # BatchNorm1d in eval mode with running_mean=0, running_var=1 -> pure affine.
    s1, t1 = g1 / jnp.sqrt(1.0 + eps), be1
    s2, t2 = g2 / jnp.sqrt(1.0 + eps), be2
    params = (w1, b1, s1, t1, w2, b2, s2, t2)

    pooled, pos_out, batch_out = sa_module_core(x, pos, batch, params, B, tile_n=2048)
    jax.block_until_ready((pooled, pos_out, batch_out))

    ref_exact = _reference_mirrored(x, pos, batch, params, B)
    ref_f32 = _reference_f32(x, pos, batch, params, B)

    assert pooled.shape == (B, F) and pos_out.shape == (B, 3) and batch_out.shape == (B,)
    # Tight check vs a reference with identical numerics (bf16 MXU inputs, split W1, BN1 folded).
    assert jnp.allclose(pooled, ref_exact, atol=2e-3, rtol=2e-3), \
        float(jnp.max(jnp.abs(pooled - ref_exact)))
    # Loose check vs the unfolded f32 math (only bf16 rounding of matmul inputs differs).
    assert jnp.allclose(pooled, ref_f32, atol=5e-2, rtol=5e-2), \
        float(jnp.max(jnp.abs(pooled - ref_f32)))
    assert jnp.all(pos_out == 0) and jnp.all(batch_out == jnp.arange(B))
    print("KERNEL_OK")
</pallas_src>

<mosaic_0001>
module attributes {stable_mosaic.version = 11 : i64} {
  func.func @_sa_core_kernel(%arg0: i32, %arg1: i32, %arg2: memref<3xi32, #tpu.memory_space<smem>>, %arg3: memref<1xi32, #tpu.memory_space<smem>>, %arg4: memref<1xi32, #tpu.memory_space<smem>>, %arg5: memref<64x13xf32, #tpu.memory_space<vmem>>, %arg6: memref<64x3xf32, #tpu.memory_space<vmem>>, %arg7: memref<13x128xbf16, #tpu.memory_space<vmem>>, %arg8: memref<3x128xbf16, #tpu.memory_space<vmem>>, %arg9: memref<1x128xf32, #tpu.memory_space<vmem>>, %arg10: memref<128x128xbf16, #tpu.memory_space<vmem>>, %arg11: memref<1x128xf32, #tpu.memory_space<vmem>>, %arg12: memref<1x128xf32, #tpu.memory_space<vmem>>, %arg13: memref<1x128xf32, #tpu.memory_space<vmem>>, %arg14: memref<1x8x128xf32, #tpu.memory_space<vmem>>) attributes {dimension_semantics = [#tpu.dimension_semantics<parallel>, #tpu.dimension_semantics<arbitrary>], iteration_bounds = array<i64: 1, 1>, scalar_prefetch = 3 : i64, scratch_operands = 0 : i64, tpu.core_type = #tpu.core_type<tc>, window_params = [{transform_indices = @transform_0, window_bounds = array<i64: 64, 13>}, {transform_indices = @transform_1, window_bounds = array<i64: 64, 3>}, {pipeline_mode = #tpu.pipeline_mode<synchronous>, transform_indices = @transform_2, window_bounds = array<i64: 13, 128>}, {pipeline_mode = #tpu.pipeline_mode<synchronous>, transform_indices = @transform_3, window_bounds = array<i64: 3, 128>}, {pipeline_mode = #tpu.pipeline_mode<synchronous>, transform_indices = @transform_4, window_bounds = array<i64: 1, 128>}, {pipeline_mode = #tpu.pipeline_mode<synchronous>, transform_indices = @transform_5, window_bounds = array<i64: 128, 128>}, {pipeline_mode = #tpu.pipeline_mode<synchronous>, transform_indices = @transform_6, window_bounds = array<i64: 1, 128>}, {pipeline_mode = #tpu.pipeline_mode<synchronous>, transform_indices = @transform_7, window_bounds = array<i64: 1, 128>}, {pipeline_mode = #tpu.pipeline_mode<synchronous>, transform_indices = @transform_8, window_bounds = array<i64: 1, 128>}, {transform_indices = @transform_9, window_bounds = array<i64: 1, 8, 128>}]} {
    %c0_i32 = arith.constant 0 : i32
    %0 = arith.cmpi eq, %arg1, %c0_i32 : i32
    %1 = arith.extui %0 : i1 to i32
    %c0_i32_0 = arith.constant 0 : i32
    %2 = arith.cmpi ne, %1, %c0_i32_0 : i32
    scf.if %2 {
      %cst_30 = arith.constant 0xFF800000 : f32
      %50 = vector.broadcast %cst_30 : f32 to vector<8x128xf32>
      %c0_31 = arith.constant 0 : index
      %c0_32 = arith.constant 0 : index
      %c0_33 = arith.constant 0 : index
      %51 = vector.load %arg14[%c0_31, %c0_32, %c0_33] : memref<1x8x128xf32, #tpu.memory_space<vmem>>, vector<1x8x128xf32>
      %52 = vector.shape_cast %51 : vector<1x8x128xf32> to vector<8x128xf32>
      %53 = vector.shape_cast %50 : vector<8x128xf32> to vector<1x8x128xf32>
      tpu.vector_store %arg14[%c0_31, %c0_32, %c0_33], %53 {strides = array<i32>} : memref<1x8x128xf32, #tpu.memory_space<vmem>>, vector<1x8x128xf32>,
    } else {
    }
    %c0 = arith.constant 0 : index
    %c0_1 = arith.constant 0 : index
    %3 = vector.load %arg5[%c0, %c0_1] : memref<64x13xf32, #tpu.memory_space<vmem>>, vector<64x13xf32>
    %4 = arith.truncf %3 : vector<64x13xf32> to vector<64x13xbf16>
    %c0_2 = arith.constant 0 : index
    %c0_3 = arith.constant 0 : index
    %5 = vector.load %arg7[%c0_2, %c0_3] : memref<13x128xbf16, #tpu.memory_space<vmem>>, vector<13x128xbf16>
    %cst = arith.constant dense<0.000000e+00> : vector<64x128xf32>
    %6 = tpu.matmul %4, %5, %cst {dimension_numbers = #tpu.dot_dimension_numbers<[1], [0], [0], [1], [0, 0, 1, 1], [], []>} : vector<64x13xbf16>, vector<13x128xbf16>, vector<64x128xf32> -> vector<64x128xf32>
    %c0_4 = arith.constant 0 : index
    %c0_5 = arith.constant 0 : index
    %7 = vector.load %arg6[%c0_4, %c0_5] : memref<64x3xf32, #tpu.memory_space<vmem>>, vector<64x3xf32>
    %8 = arith.truncf %7 : vector<64x3xf32> to vector<64x3xbf16>
    %c0_6 = arith.constant 0 : index
    %c0_7 = arith.constant 0 : index
    %9 = vector.load %arg8[%c0_6, %c0_7] : memref<3x128xbf16, #tpu.memory_space<vmem>>, vector<3x128xbf16>
    %cst_8 = arith.constant dense<0.000000e+00> : vector<64x128xf32>
    %10 = tpu.matmul %8, %9, %cst_8 {dimension_numbers = #tpu.dot_dimension_numbers<[1], [0], [0], [1], [0, 0, 1, 1], [], []>} : vector<64x3xbf16>, vector<3x128xbf16>, vector<64x128xf32> -> vector<64x128xf32>
    %11 = arith.addf %6, %10 : vector<64x128xf32>
    %c0_9 = arith.constant 0 : index
    %c0_10 = arith.constant 0 : index
    %12 = vector.load %arg9[%c0_9, %c0_10] : memref<1x128xf32, #tpu.memory_space<vmem>>, vector<1x128xf32>
    %13 = vector.broadcast %12 : vector<1x128xf32> to vector<64x128xf32>
    %14 = arith.addf %11, %13 : vector<64x128xf32>
    %cst_11 = arith.constant 0.000000e+00 : f32
    %15 = vector.broadcast %cst_11 : f32 to vector<64x128xf32>
    %16 = arith.maximumf %14, %15 : vector<64x128xf32>
    %17 = arith.truncf %16 : vector<64x128xf32> to vector<64x128xbf16>
    %c0_12 = arith.constant 0 : index
    %c0_13 = arith.constant 0 : index
    %18 = vector.load %arg10[%c0_12, %c0_13] : memref<128x128xbf16, #tpu.memory_space<vmem>>, vector<128x128xbf16>
    %cst_14 = arith.constant dense<0.000000e+00> : vector<64x128xf32>
    %19 = tpu.matmul %17, %18, %cst_14 {dimension_numbers = #tpu.dot_dimension_numbers<[1], [0], [0], [1], [0, 0, 1, 1], [], []>} : vector<64x128xbf16>, vector<128x128xbf16>, vector<64x128xf32> -> vector<64x128xf32>
    %c0_15 = arith.constant 0 : index
    %c0_16 = arith.constant 0 : index
    %20 = vector.load %arg11[%c0_15, %c0_16] : memref<1x128xf32, #tpu.memory_space<vmem>>, vector<1x128xf32>
    %21 = vector.broadcast %20 : vector<1x128xf32> to vector<64x128xf32>
    %22 = arith.addf %19, %21 : vector<64x128xf32>
    %cst_17 = arith.constant 0.000000e+00 : f32
    %23 = vector.broadcast %cst_17 : f32 to vector<64x128xf32>
    %24 = arith.maximumf %22, %23 : vector<64x128xf32>
    %c0_18 = arith.constant 0 : index
    %c0_19 = arith.constant 0 : index
    %25 = vector.load %arg12[%c0_18, %c0_19] : memref<1x128xf32, #tpu.memory_space<vmem>>, vector<1x128xf32>
    %26 = vector.broadcast %25 : vector<1x128xf32> to vector<64x128xf32>
    %27 = arith.mulf %24, %26 : vector<64x128xf32>
    %c0_20 = arith.constant 0 : index
    %c0_21 = arith.constant 0 : index
    %28 = vector.load %arg13[%c0_20, %c0_21] : memref<1x128xf32, #tpu.memory_space<vmem>>, vector<1x128xf32>
    %29 = vector.broadcast %28 : vector<1x128xf32> to vector<64x128xf32>
    %30 = arith.addf %27, %29 : vector<64x128xf32>
    %c1_i32 = arith.constant 1 : i32
    %31 = arith.muli %arg0, %c1_i32 : i32
    %32 = arith.addi %31, %arg1 : i32
    %c64_i32 = arith.constant 64 : i32
    %33 = arith.muli %32, %c64_i32 : i32
    %34 = tpu.iota {dimensions = array<i32: 0>} : vector<64x1xi32>
    %35 = vector.broadcast %33 : i32 to vector<64x1xi32>
    %36 = arith.addi %35, %34 : vector<64x1xi32>
    %37 = tpu.iota {dimensions = array<i32: 0>} : vector<8x1xi32>
    %38 = arith.index_cast %32 : i32 to index
    %39 = memref.load %arg3[%38] : memref<1xi32, #tpu.memory_space<smem>>
    %40 = arith.index_cast %32 : i32 to index
    %41 = memref.load %arg4[%40] : memref<1xi32, #tpu.memory_space<smem>>
    %c0_22 = arith.constant 0 : index
    %c0_23 = arith.constant 0 : index
    %c0_24 = arith.constant 0 : index
    %42 = vector.load %arg14[%c0_22, %c0_23, %c0_24] : memref<1x8x128xf32, #tpu.memory_space<vmem>>, vector<1x8x128xf32>
    %43 = vector.shape_cast %42 : vector<1x8x128xf32> to vector<8x128xf32>
    %cst_25 = arith.constant 0xFF800000 : f32
    %44 = arith.subi %41, %39 : i32
    %45 = arith.addi %39, %44 : i32
    %c1_i32_26 = arith.constant 1 : i32
    %46 = scf.for %arg15 = %39 to %45 step %c1_i32_26 iter_args(%arg16 = %43) -> (vector<8x128xf32>)  : i32 {
      %50 = arith.index_cast %arg15 : i32 to index
      %51 = memref.load %arg2[%50] : memref<3xi32, #tpu.memory_space<smem>>
      %52 = vector.broadcast %51 : i32 to vector<64x1xi32>
      %53 = arith.cmpi sge, %36, %52 : vector<64x1xi32>
      %c1_i32_30 = arith.constant 1 : i32
      %54 = arith.addi %arg15, %c1_i32_30 : i32
      %55 = arith.index_cast %54 : i32 to index
      %56 = memref.load %arg2[%55] : memref<3xi32, #tpu.memory_space<smem>>
      %57 = vector.broadcast %56 : i32 to vector<64x1xi32>
      %58 = arith.cmpi slt, %36, %57 : vector<64x1xi32>
      %59 = arith.andi %53, %58 : vector<64x1xi1>
      %60 = vector.shape_cast %59 : vector<64x1xi1> to vector<64x1xi1>
      %61 = vector.broadcast %60 : vector<64x1xi1> to vector<64x128xi1>
      %62 = vector.broadcast %cst_25 : f32 to vector<64x128xf32>
      %63 = arith.select %61, %30, %62 : vector<64x128xi1>, vector<64x128xf32>
      %cst_31 = arith.constant dense<0xFF800000> : vector<128xf32>
      %64 = vector.multi_reduction <maximumf>, %63, %cst_31 [0] : vector<64x128xf32> to vector<128xf32>
      %65 = vector.shape_cast %64 : vector<128xf32> to vector<1x128xf32>
      %66 = vector.broadcast %arg15 : i32 to vector<8x1xi32>
      %67 = arith.cmpi eq, %37, %66 : vector<8x1xi32>
      %68 = vector.broadcast %65 : vector<1x128xf32> to vector<8x128xf32>
      %69 = arith.maximumf %arg16, %68 : vector<8x128xf32>
      %70 = vector.shape_cast %67 : vector<8x1xi1> to vector<8x1xi1>
      %71 = vector.broadcast %70 : vector<8x1xi1> to vector<8x128xi1>
      %72 = arith.select %71, %69, %arg16 : vector<8x128xi1>, vector<8x128xf32>
      scf.yield %72 : vector<8x128xf32>
    }
    %c0_27 = arith.constant 0 : index
    %c0_28 = arith.constant 0 : index
    %c0_29 = arith.constant 0 : index
    %47 = vector.load %arg14[%c0_27, %c0_28, %c0_29] : memref<1x8x128xf32, #tpu.memory_space<vmem>>, vector<1x8x128xf32>
    %48 = vector.shape_cast %47 : vector<1x8x128xf32> to vector<8x128xf32>
    %49 = vector.shape_cast %46 : vector<8x128xf32> to vector<1x8x128xf32>
    tpu.vector_store %arg14[%c0_27, %c0_28, %c0_29], %49 {strides = array<i32>} : memref<1x8x128xf32, #tpu.memory_space<vmem>>, vector<1x8x128xf32>,
    return
  }
  func.func @transform_0(%arg0: i32, %arg1: i32, %arg2: memref<3xi32, #tpu.memory_space<smem>>, %arg3: memref<1xi32, #tpu.memory_space<smem>>, %arg4: memref<1xi32, #tpu.memory_space<smem>>) -> (i32, i32) {
    %c1_i32 = arith.constant 1 : i32
    %0 = arith.muli %arg0, %c1_i32 : i32
    %1 = arith.addi %0, %arg1 : i32
    %c0_i32 = arith.constant 0 : i32
    %2 = arith.minsi %1, %c0_i32 : i32
    %c0_i32_0 = arith.constant 0 : i32
    %c0_i32_1 = arith.constant 0 : i32
    return %2, %c0_i32_0 : i32, i32
  }
  func.func @transform_1(%arg0: i32, %arg1: i32, %arg2: memref<3xi32, #tpu.memory_space<smem>>, %arg3: memref<1xi32, #tpu.memory_space<smem>>, %arg4: memref<1xi32, #tpu.memory_space<smem>>) -> (i32, i32) {
    %c1_i32 = arith.constant 1 : i32
    %0 = arith.muli %arg0, %c1_i32 : i32
    %1 = arith.addi %0, %arg1 : i32
    %c0_i32 = arith.constant 0 : i32
    %2 = arith.minsi %1, %c0_i32 : i32
    %c0_i32_0 = arith.constant 0 : i32
    %c0_i32_1 = arith.constant 0 : i32
    return %2, %c0_i32_0 : i32, i32
  }
  func.func @transform_2(%arg0: i32, %arg1: i32, %arg2: memref<3xi32, #tpu.memory_space<smem>>, %arg3: memref<1xi32, #tpu.memory_space<smem>>, %arg4: memref<1xi32, #tpu.memory_space<smem>>) -> (i32, i32) {
    %c0_i32 = arith.constant 0 : i32
    %c0_i32_0 = arith.constant 0 : i32
    %c0_i32_1 = arith.constant 0 : i32
    return %c0_i32, %c0_i32_0 : i32, i32
  }
  func.func @transform_3(%arg0: i32, %arg1: i32, %arg2: memref<3xi32, #tpu.memory_space<smem>>, %arg3: memref<1xi32, #tpu.memory_space<smem>>, %arg4: memref<1xi32, #tpu.memory_space<smem>>) -> (i32, i32) {
    %c0_i32 = arith.constant 0 : i32
    %c0_i32_0 = arith.constant 0 : i32
    %c0_i32_1 = arith.constant 0 : i32
    return %c0_i32, %c0_i32_0 : i32, i32
  }
  func.func @transform_4(%arg0: i32, %arg1: i32, %arg2: memref<3xi32, #tpu.memory_space<smem>>, %arg3: memref<1xi32, #tpu.memory_space<smem>>, %arg4: memref<1xi32, #tpu.memory_space<smem>>) -> (i32, i32) {
    %c0_i32 = arith.constant 0 : i32
    %c0_i32_0 = arith.constant 0 : i32
    %c0_i32_1 = arith.constant 0 : i32
    return %c0_i32, %c0_i32_0 : i32, i32
  }
  func.func @transform_5(%arg0: i32, %arg1: i32, %arg2: memref<3xi32, #tpu.memory_space<smem>>, %arg3: memref<1xi32, #tpu.memory_space<smem>>, %arg4: memref<1xi32, #tpu.memory_space<smem>>) -> (i32, i32) {
    %c0_i32 = arith.constant 0 : i32
    %c0_i32_0 = arith.constant 0 : i32
    %c0_i32_1 = arith.constant 0 : i32
    return %c0_i32, %c0_i32_0 : i32, i32
  }
  func.func @transform_6(%arg0: i32, %arg1: i32, %arg2: memref<3xi32, #tpu.memory_space<smem>>, %arg3: memref<1xi32, #tpu.memory_space<smem>>, %arg4: memref<1xi32, #tpu.memory_space<smem>>) -> (i32, i32) {
    %c0_i32 = arith.constant 0 : i32
    %c0_i32_0 = arith.constant 0 : i32
    %c0_i32_1 = arith.constant 0 : i32
    return %c0_i32, %c0_i32_0 : i32, i32
  }
  func.func @transform_7(%arg0: i32, %arg1: i32, %arg2: memref<3xi32, #tpu.memory_space<smem>>, %arg3: memref<1xi32, #tpu.memory_space<smem>>, %arg4: memref<1xi32, #tpu.memory_space<smem>>) -> (i32, i32) {
    %c0_i32 = arith.constant 0 : i32
    %c0_i32_0 = arith.constant 0 : i32
    %c0_i32_1 = arith.constant 0 : i32
    return %c0_i32, %c0_i32_0 : i32, i32
  }
  func.func @transform_8(%arg0: i32, %arg1: i32, %arg2: memref<3xi32, #tpu.memory_space<smem>>, %arg3: memref<1xi32, #tpu.memory_space<smem>>, %arg4: memref<1xi32, #tpu.memory_space<smem>>) -> (i32, i32) {
    %c0_i32 = arith.constant 0 : i32
    %c0_i32_0 = arith.constant 0 : i32
    %c0_i32_1 = arith.constant 0 : i32
    return %c0_i32, %c0_i32_0 : i32, i32
  }
  func.func @transform_9(%arg0: i32, %arg1: i32, %arg2: memref<3xi32, #tpu.memory_space<smem>>, %arg3: memref<1xi32, #tpu.memory_space<smem>>, %arg4: memref<1xi32, #tpu.memory_space<smem>>) -> (i32, i32, i32) {
    %c0_i32 = arith.constant 0 : i32
    %c0_i32_0 = arith.constant 0 : i32
    %c0_i32_1 = arith.constant 0 : i32
    return %arg0, %c0_i32, %c0_i32_0 : i32, i32, i32
  }
}

</mosaic_0001>

<bundles_post_ra>
// kernel: tpu_custom_call.1
= control target key start
LH: loop header
LB: loop body
LE: loop exit
PB: predicated region body
PF: predicated region fallthrough
CT: control target
= control target key end

     0   :  { %s1155_s0 = inlined_call_operand.vmem [shape: s32[3], index: 0, kind: input, shape index: {}]   ;;  %s1156_s1 = inlined_call_operand.<no memory space> [shape: s32[1], index: 1, kind: input, shape index: {}]   ;;  %s1157_s2 = inlined_call_operand.<no memory space> [shape: s32[1], index: 2, kind: input, shape index: {}]   ;;  %s1158_s3 = inlined_call_operand.vmem [shape: f32[64,13], index: 3, kind: input, shape index: {}]   ;;  %s1159_s4 = inlined_call_operand.vmem [shape: f32[64,3], index: 4, kind: input, shape index: {}]   ;;  %s1160_s5 = inlined_call_operand.vmem [shape: bf16[13,128], index: 5, kind: input, shape index: {}]   ;;  %s1161_s6 = inlined_call_operand.vmem [shape: bf16[3,128], index: 6, kind: input, shape index: {}]   ;;  %s1162_s7 = inlined_call_operand.vmem [shape: f32[1,128], index: 7, kind: input, shape index: {}]   ;;  %s1163_s8 = inlined_call_operand.vmem [shape: bf16[128,128], index: 8, kind: input, shape index: {}]   ;;  %s1164_s9 = inlined_call_operand.vmem [shape: f32[1,128], index: 9, kind: input, shape index: {}]   ;;  %s1165_s10 = inlined_call_operand.vmem [shape: f32[1,128], index: 10, kind: input, shape index: {}]   ;;  %s1166_s11 = inlined_call_operand.vmem [shape: f32[1,128], index: 11, kind: input, shape index: {}]   ;;  %s1167_s12 = inlined_call_operand.hbm [shape: f32[1,8,128], index: 12, kind: output, shape index: {}]  }
   0x1   :  { %s17_s23 = sshll.u32 %s1155_s0, 4  ;;  %s18_s23 = int_to_ptr.vmem [resolvable:$true] %s17_s23 }
   0x2   :  { %s786_s24 = scalar_lea.vmem %s18_s23, 16  ;;  %p791_p1 = scmp.lt.s32.totalorder %s18_s23, %s18_s23 }
   0x3   :  { %p787_p0 = scmp.ne.s32.totalorder %s18_s23, %s786_s24  ;;  %p792_p2 = scmp.lt.s32.totalorder %s786_s24, %s786_s24 }
   0x5   :  { %p793_p3 = por %p792_p2, %p791_p1 }
   0x7   :  { %p794_p4 = pnand %p793_p3, %p787_p0 }
   0x9   :  { %797 = shalt.err (!%p794_p4)  }
   0xa   :  { %s848_s25 = smov [#allocation3]  }
   0xb   :  { %20 = dma.vmem_to_smem %s18_s23, 16, %s848_s25, [#allocation2] }
   0xc   :  { %832 = dma.done.wait [#allocation2], 16 }
   0xd   :  { %833 = vsyncadd [#allocation2], 4294967280 }
   0xe   :  { %24 = sfence }
   0xf   :  { %25 = vsyncpa [#allocation7], 0  ;;  %v140_v0 = vld [vmem:[%s1161_s6] sm:$0x3]  ;;  %vm154_vm0 = vcmask 1040384   ;;  %v849_v1 = vmov -inf   ;;  %p647_p5 = scmp.ge.s32.totalorder %s1156_s1, %s1157_s2 }
  0x10   :  { %113 = vst [vmem:[#allocation6] sm:$0xff] %v849_v1  ;;  %vm155_vm1 = vcmask 1041408   ;;  %vm244_vm2 = vcmask 1045504   ;;  %v128_v2 = vld [vmem:[%s1159_s4] sm:$0xff]  ;;  %v129_v3 = vld [vmem:[%s1159_s4 + $0x8] sm:$0xff]  ;;  %vm141_vm3 = vcmask 23552  }
  0x11   :  { %v850_v4 = vmov 65535   ;;  %v136_v7 = vpack.c.bf16 %v129_v3, %v128_v2  ;;  %v130_v8 = vld [vmem:[%s1159_s4 + $0x10] sm:$0xff]  ;;  %v131_v9 = vld [vmem:[%s1159_s4 + $0x18] sm:$0xff]  ;;  %v777_v11 = vld [vmem:[%s1160_s5] sm:$0x7f]   ;;  %vm245_vm4 = vcmask 1046528  }
  0x12   :  { %v156_v5 = vsel %vm154_vm0, 4294967295, %v850_v4  ;;  %v246_v6 = vsel %vm244_vm2, 4294967295, %v850_v4  ;;  %v132_v14 = vld [vmem:[%s1159_s4 + $0x20] sm:$0xff]  ;;  %v133_v15 = vld [vmem:[%s1159_s4 + $0x28] sm:$0xff]  ;;  %v137_v17 = vpack.c.bf16 %v131_v9, %v130_v8  ;;  %v134_v20 = vld [vmem:[%s1159_s4 + $0x30] sm:$0xff]  ;;  %vm231_vm5 = vcmask 105472  }
  0x13   :  { %v157_v10 = vsel %vm155_vm1, %v156_v5, 0  ;;  %699 = vmatprep.mubr.msk.bf16.mxu0 %vm141_vm3, %v136_v7  ;;  %v247_v13 = vsel %vm245_vm4, %v246_v6, 0  ;;  %v138_v18 = vpack.c.bf16 %v133_v15, %v132_v14  ;;  %v778_v19 = vld [vmem:[%s1163_s8] sm:$0xff]   ;;  %v779_v21 = vld [vmem:[%s1163_s8 + $0x8] sm:$0xff]   ;;  %v135_v22 = vld [vmem:[%s1159_s4 + $0x38] sm:$0xff]  ;;  %v519_v7 = vlaneseq }
  0x14   :  { %v159_v12 = vand.u32 %v157_v10, %v140_v0  ;;  %v249_v16 = vand.u32 %v777_v11, %v247_v13  ;;  %717 = vmatprep.subr.bf16.mxu1 %v778_v19  ;;  %v114_v23 = vld [vmem:[%s1158_s3] sm:$0xff]  ;;  %v115_v24 = vld [vmem:[%s1158_s3 + $0x8] sm:$0xff]  ;;  %v780_v25 = vld [vmem:[%s1163_s8 + $0x10] sm:$0xff]   ;;  %v139_v26 = vpack.c.bf16 %v135_v22, %v134_v20 }
  0x15   :  { %718 = vmatpush3.bf16.msra.mxu1 %v778_v19  ;;  %v122_v27 = vpack.c.bf16 %v115_v24, %v114_v23  ;;  %v781_v28 = vld [vmem:[%s1163_s8 + $0x18] sm:$0xff]   ;;  %v116_v29 = vld [vmem:[%s1158_s3 + $0x10] sm:$0xff]  ;;  %v118_v31 = vld [vmem:[%s1158_s3 + $0x20] sm:$0xff]  ;;  %v1009_v8 = vshrl.u32 %v519_v7, 7 }
  0x16   :  { %697 = vmatprep.subr.bf16.mxu0 %v159_v12  ;;  %719 = vmatprep.subr.bf16.mxu1 %v779_v21  ;;  %v117_v30 = vld [vmem:[%s1158_s3 + $0x18] sm:$0xff]  ;;  %v119_v32 = vld [vmem:[%s1158_s3 + $0x28] sm:$0xff]  ;;  %v782_v33 = vld [vmem:[%s1163_s8 + $0x20] sm:$0xff]  }
  0x17   :  { %698 = vmatpush3.bf16.msra.mxu0 %v159_v12  ;;  %v123_v34 = vpack.c.bf16 %v117_v30, %v116_v29  ;;  %v124_v35 = vpack.c.bf16 %v119_v32, %v118_v31  ;;  %v783_v36 = vld [vmem:[%s1163_s8 + $0x28] sm:$0xff]   ;;  %v120_v37 = vld [vmem:[%s1158_s3 + $0x30] sm:$0xff]  ;;  %v121_v38 = vld [vmem:[%s1158_s3 + $0x38] sm:$0xff]  ;;  %v1012_v9 = vadd.s32 8, %v1009_v8  ;;  %v1015_v10 = vadd.s32 16, %v1009_v8 }
  0x18   :  { %707 = vmatprep.subr.bf16.mxu0 %v249_v16  ;;  %v125_v39 = vpack.c.bf16 %v121_v38, %v120_v37  ;;  %v784_v40 = vld [vmem:[%s1163_s8 + $0x30] sm:$0xff]   ;;  %v785_v41 = vld [vmem:[%s1163_s8 + $0x38] sm:$0xff]   ;;  %v663_v42 = vld [vmem:[%s1162_s7] ss:$0 sm:$0xff]  ;;  %v1018_v11 = vadd.s32 24, %v1009_v8  ;;  %v1021_v12 = vadd.s32 32, %v1009_v8 }
  0x19   :  { %720 = vmatpush3.bf16.msra.mxu1 %v779_v21  ;;  %v1024_v13 = vadd.s32 40, %v1009_v8  ;;  %v1027_v14 = vadd.s32 48, %v1009_v8  ;;  %v1030_v15 = vadd.s32 56, %v1009_v8  ;;  %v673_v20 = vld [vmem:[%s1165_s10] ss:$0 sm:$0xff] }
  0x1a   :  { %700 = vmatmul.mubr.msk.bf16.vlgmr.msra.gmra.mrb[0].mxu0 %vm141_vm3, %v137_v17  ;;  %721 = vmatprep.subr.bf16.mxu1 %v780_v25 }
  0x1b   :  { %708 = vmatpush3.bf16.msra.mxu0 %v249_v16  ;;  %703 = vmatprep.mubr.msk.bf16.mxu0 %vm141_vm3, %v138_v18  ;;  %v664_v16 = vld [vmem:[%s1164_s9] ss:$0 sm:$0xff] }
  0x1d   :  { %722 = vmatpush3.bf16.msra.mxu1 %v780_v25 }
  0x1e   :  { %723 = vmatprep.subr.bf16.mxu1 %v781_v28 }
  0x21   :  { %724 = vmatpush3.bf16.msra.mxu1 %v781_v28 }
  0x22   :  { %704 = vmatmul.mubr.msk.bf16.gmra.mrb[4].mxu0 %vm141_vm3, %v139_v26  ;;  %725 = vmatprep.subr.bf16.mxu1 %v782_v33  ;;  %v674_v26 = vld [vmem:[%s1166_s11] ss:$0 sm:$0xff] }
  0x23   :  { %709 = vmatprep.mubr.msk.bf16.mxu0 %vm231_vm5, %v122_v27 }
  0x25   :  { %726 = vmatpush3.bf16.msra.mxu1 %v782_v33 }
  0x26   :  { %727 = vmatprep.subr.bf16.mxu1 %v783_v36 }
  0x29   :  { %728 = vmatpush3.bf16.msra.mxu1 %v783_v36 }
  0x2a   :  { %710 = vmatmul.mubr.msk.bf16.vlgmr.msra.gmra.mrb[0].mxu0 %vm231_vm5, %v123_v34  ;;  %729 = vmatprep.subr.bf16.mxu1 %v784_v40 }
  0x2b   :  { %713 = vmatprep.mubr.msk.bf16.mxu0 %vm231_vm5, %v124_v35 }
  0x2d   :  { %730 = vmatpush3.bf16.msra.mxu1 %v784_v40 }
  0x2e   :  { %731 = vmatprep.subr.bf16.mxu1 %v785_v41 }
  0x31   :  { %732 = vmatpush3.bf16.msra.mxu1 %v785_v41 }
  0x32   :  { %714 = vmatmul.mubr.msk.bf16.gmra.mrb[4].mxu0 %vm231_vm5, %v125_v39 }
  0xfd   :  { %v711_v43 = vpop.f32.mrb[0].mxu0 }
  0xfe   :  { %v325_v44 = vadd.f32 %v711_v43, %v663_v42  ;;  %v285_v45 = vpop.f32.mrb[1].mxu0 }
  0xff   :  { %v323_v46 = vadd.f32 %v663_v42, %v285_v45  ;;  %v712_v47 = vpop.f32.mrb[2].mxu0 }
 0x100   :  { %v326_v48 = vadd.f32 %v712_v47, %v663_v42  ;;  %v288_v49 = vpop.f32.mrb[3].mxu0  ;;  %v333_v51 = vmax.f32 %v325_v44, 0.0 }
 0x101   :  { %v324_v50 = vadd.f32 %v663_v42, %v288_v49  ;;  %v331_v53 = vmax.f32 %v323_v46, 0.0 }
 0x102   :  { %v334_v52 = vmax.f32 %v326_v48, 0.0 }
 0x103   :  { %v332_v54 = vmax.f32 %v324_v50, 0.0 }
 0x104   :  { %v340_v55 = vpack.c.bf16 %v334_v52, %v333_v51 }
 0x105   :  { %v715_v56 = vpop.f32.mrb[4].mxu0  ;;  %v339_v57 = vpack.c.bf16 %v332_v54, %v331_v53 }
 0x106   :  { %v329_v58 = vadd.f32 %v715_v56, %v663_v42  ;;  %v301_v59 = vpop.f32.mrb[5].mxu0 }
 0x107   :  { %v327_v60 = vadd.f32 %v663_v42, %v301_v59  ;;  %v716_v61 = vpop.f32.mrb[6].mxu0  ;;  %733 = vmatprep.mubr.bf16.mxu1 %v339_v57  ;;  %v1063_v59 = vmov -inf  }
 0x108   :  { %v330_v62 = vadd.f32 %v716_v61, %v663_v42  ;;  %v304_v63 = vpop.f32.mrb[7].mxu0  ;;  %734 = vmatmul.mubr.bf16.vlgmr.msra.gmra.mrb[0].mxu1 %v340_v55  ;;  %v337_v1 = vmax.f32 %v329_v58, 0.0 }
 0x109   :  { %v328_v0 = vadd.f32 %v663_v42, %v304_v63  ;;  %v335_v3 = vmax.f32 %v327_v60, 0.0  ;;  %v1065_v60 = vmov (!%p647_p5), -inf  }
 0x10a   :  { %v338_v2 = vmax.f32 %v330_v62, 0.0 }
 0x10b   :  { %v336_v4 = vmax.f32 %v328_v0, 0.0 }
 0x10c   :  { %v342_v5 = vpack.c.bf16 %v338_v2, %v337_v1 }
 0x10d   :  { %v341_v6 = vpack.c.bf16 %v336_v4, %v335_v3 }
 0x10f   :  { %737 = vmatprep.mubr.bf16.mxu1 %v341_v6 }
 0x110   :  { %738 = vmatmul.mubr.bf16.gmra.mrb[4].mxu1 %v342_v5 }
 0x1db   :  { %v735_v17 = vpop.f32.mrb[0].mxu1 }
 0x1dc   :  { %v457_v18 = vadd.f32 %v735_v17, %v664_v16  ;;  %v448_v19 = vpop.f32.mrb[1].mxu1 }
 0x1dd   :  { %v449_v21 = vadd.f32 %v664_v16, %v448_v19  ;;  %v736_v22 = vpop.f32.mrb[2].mxu1 }
 0x1de   :  { %v481_v23 = vmax.f32 %v457_v18, 0.0  ;;  %v460_v24 = vadd.f32 %v736_v22, %v664_v16  ;;  %v451_v25 = vpop.f32.mrb[3].mxu1 }
 0x1df   :  { %v479_v27 = vmax.f32 %v449_v21, 0.0  ;;  %v452_v28 = vadd.f32 %v664_v16, %v451_v25 }
 0x1e0   :  { %v496_v29 = vmul.f32 %v673_v20, %v481_v23  ;;  %v482_v30 = vmax.f32 %v460_v24, 0.0 }
 0x1e1   :  { %v494_v31 = vmul.f32 %v673_v20, %v479_v27  ;;  %v480_v32 = vmax.f32 %v452_v28, 0.0 }
 0x1e2   :  { %v1041_v33 = vadd.f32 %v674_v26, %v496_v29  ;;  %v497_v34 = vmul.f32 %v673_v20, %v482_v30 }
 0x1e3   :  { %v1043_v35 = vadd.f32 %v674_v26, %v494_v31  ;;  %v495_v36 = vmul.f32 %v673_v20, %v480_v32  ;;  %v739_v37 = vpop.f32.mrb[4].mxu1 }
 0x1e4   :  { %v1045_v38 = vadd.f32 %v674_v26, %v497_v34  ;;  %v473_v39 = vadd.f32 %v739_v37, %v664_v16  ;;  %v464_v40 = vpop.f32.mrb[5].mxu1 }
 0x1e5   :  { %v1047_v41 = vadd.f32 %v674_v26, %v495_v36  ;;  %v465_v42 = vadd.f32 %v664_v16, %v464_v40  ;;  %v740_v43 = vpop.f32.mrb[6].mxu1 }
 0x1e6   :  { %v485_v44 = vmax.f32 %v473_v39, 0.0  ;;  %v476_v45 = vadd.f32 %v740_v43, %v664_v16  ;;  %v467_v46 = vpop.f32.mrb[7].mxu1 }
 0x1e7   :  { %v483_v47 = vmax.f32 %v465_v42, 0.0  ;;  %v468_v48 = vadd.f32 %v664_v16, %v467_v46  ;;  %649 = sbr.rel (%p647_p5) target bundleno = 534 (0x216), region = 67 }
 0x1e8   :  { %v500_v49 = vmul.f32 %v673_v20, %v485_v44  ;;  %v486_v50 = vmax.f32 %v476_v45, 0.0 }
 0x1e9   :  { %v498_v51 = vmul.f32 %v673_v20, %v483_v47  ;;  %v484_v52 = vmax.f32 %v468_v48, 0.0 }
 0x1ea   :  { %v1049_v53 = vadd.f32 %v674_v26, %v500_v49  ;;  %v501_v54 = vmul.f32 %v673_v20, %v486_v50 }
 0x1eb   :  { %v1051_v55 = vadd.f32 %v674_v26, %v498_v51  ;;  %v499_v56 = vmul.f32 %v673_v20, %v484_v52 }
 0x1ec   :  { %v1053_v57 = vadd.f32 %v674_v26, %v501_v54 }
 0x1ed   :  { %v1055_v58 = vadd.f32 %v674_v26, %v499_v56 }
 0x1ee LB: > { %s547_s5 = sld [smem:[#allocation3 + %s842_s1]]  ;;  %s1078_s22 = sadd.s32 1, %s842_s1   ;;  %v613_v31 = vstv %s842_s1  ;;  %s842_s1 = sphi %s1156_s1, %s1177_s1   ;;  %v838_v60 = vphi %v1065_v60, %v1176_v60  }
 0x1ef   : > { %s558_s23 = sld [smem:[#allocation3 + %s1078_s22]]  ;;  %p542_p6 = scmp.ge.s32.totalorder %s1078_s22, %s1157_s2 }
 0x1f0   : > { %s1177_s1 = smov %s1078_s22 }
 0x1f4   : > { %v548_v61 = vstv %s547_s5 }
 0x1f5   : > { %vm549_vm6 = vcmp.ge.s32.totalorder %v1009_v8, %v548_v61  ;;  %vm550_vm7 = vcmp.ge.s32.totalorder %v1012_v9, %v548_v61  ;;  %v559_v62 = vstv %s558_s23  ;;  %vm551_vm8 = vcmp.ge.s32.totalorder %v1015_v10, %v548_v61 }
 0x1f6   : > { %vm560_vm9 = vcmp.lt.s32.totalorder %v1009_v8, %v559_v62  ;;  %vm561_vm10 = vcmp.lt.s32.totalorder %v1012_v9, %v559_v62  ;;  %vm562_vm11 = vcmp.lt.s32.totalorder %v1015_v10, %v559_v62  ;;  %vm552_vm12 = vcmp.ge.s32.totalorder %v1018_v11, %v548_v61 }
 0x1f7   : > { %vm563_vm13 = vcmp.lt.s32.totalorder %v1018_v11, %v559_v62  ;;  %vm1089_vm14 = vmand %vm549_vm6, %vm560_vm9  ;;  %vm553_vm15 = vcmp.ge.s32.totalorder %v1021_v12, %v548_v61  ;;  %vm564_vm0 = vcmp.lt.s32.totalorder %v1021_v12, %v559_v62  ;;  %vm554_vm2 = vcmp.ge.s32.totalorder %v1024_v13, %v548_v61 }
 0x1f8   : > { %vm1095_vm1 = vmand %vm550_vm7, %vm561_vm10  ;;  %vm565_vm3 = vcmp.lt.s32.totalorder %v1024_v13, %v559_v62  ;;  %vm555_vm5 = vcmp.ge.s32.totalorder %v1027_v14, %v548_v61  ;;  %vm566_vm6 = vcmp.lt.s32.totalorder %v1027_v14, %v559_v62  ;;  %v592_v3 = vsel %vm1089_vm14, %v1043_v35, -inf }
 0x1f9   : > { %vm1101_vm4 = vmand %vm551_vm8, %vm562_vm11  ;;  %vm556_vm7 = vcmp.ge.s32.totalorder %v1030_v15, %v548_v61  ;;  %vm567_vm10 = vcmp.lt.s32.totalorder %v1030_v15, %v559_v62  ;;  %v593_v4 = vsel %vm1095_vm1, %v1047_v41, -inf  ;;  %vm614_vm14 = vcmp.eq.s32.totalorder %v1009_v8, %v613_v31 }
 0x1fa   : > { %vm1107_vm9 = vmand %vm552_vm12, %vm563_vm13  ;;  %v594_v5 = vsel %vm1101_vm4, %v1041_v33, -inf }
 0x1fb   : > { %vm572_vm8 = vmand %vm553_vm15, %vm564_vm0  ;;  %v595_v7 = vsel %vm1107_vm9, %v1045_v38, -inf }
 0x1fc   : > { %vm573_vm11 = vmand %vm554_vm2, %vm565_vm3  ;;  %v596_v6 = vsel %vm572_vm8, %v1051_v55, -inf }
 0x1fd   : > { %vm574_vm12 = vmand %vm555_vm5, %vm566_vm6  ;;  %v597_v16 = vsel %vm573_vm11, %v1055_v58, -inf  ;;  %v600_v17 = vmax.f32 %v592_v3, %v596_v6 }
 0x1fe   : > { %vm575_vm13 = vmand %vm556_vm7, %vm567_vm10  ;;  %v598_v18 = vsel %vm574_vm12, %v1049_v53, -inf  ;;  %v601_v19 = vmax.f32 %v593_v4, %v597_v16 }
 0x1ff   : > { %v599_v20 = vsel %vm575_vm13, %v1053_v57, -inf  ;;  %v602_v21 = vmax.f32 %v594_v5, %v598_v18 }
 0x200   : > { %v603_v22 = vmax.f32 %v595_v7, %v599_v20  ;;  %v604_v23 = vmax.f32 %v600_v17, %v601_v19 }
 0x202   : > { %v605_v24 = vmax.f32 %v602_v21, %v603_v22 }
 0x204   : > { %v606_v25 = vmax.f32 %v604_v23, %v605_v24 }
 0x206   : > { %v607_v26 = vrot.slane %v606_v25, 4 }
 0x208   : > { %v608_v27 = vmax.f32 %v606_v25, %v607_v26 }
 0x20a   : > { %v609_v28 = vrot.slane %v608_v27, 2 }
 0x20c   : > { %v610_v29 = vmax.f32 %v608_v27, %v609_v28 }
 0x20e   : > { %v611_v30 = vrot.slane %v610_v29, 1 }
 0x20f   :  { %545 = sbr.rel (!%p542_p6) target bundleno = 494 (0x1ee), region = 73 }
 0x210   : > { %v612_v32 = vmax.f32 %v610_v29, %v611_v30 }
 0x212   : > { %v615_v34 = vmax.f32 %v838_v60, %v612_v32 }
 0x214   : > { %v618_v36 = vsel %vm614_vm14, %v615_v34, %v838_v60  }
 0x215   : > { %v1176_v60 = vmov %v618_v36  ;;  %v1178_v59 = vmov (%p542_p6), %v618_v36 }
 0x216 PF:  { %619 = vst [vmem:[#allocation6] sm:$0xff] %v846_v59  ;;  %s851_s1 = smov [#allocation6]   ;;  %v846_v59 = vphi %v1063_v59, %v1178_v59  }
 0x217   :  { %s626_s26 = sshll.u32 %s851_s1, 4  ;;  %s627_s26 = int_to_ptr.vmem [resolvable:$true] %s626_s26 }
 0x218   :  { %s798_s27 = scalar_lea.vmem %s627_s26, 128  ;;  %p803_p8 = scmp.lt.s32.totalorder %s627_s26, %s627_s26 }
 0x219   :  { %p799_p7 = scmp.ne.s32.totalorder %s627_s26, %s798_s27  ;;  %p804_p9 = scmp.lt.s32.totalorder %s798_s27, %s798_s27 }
 0x21b   :  { %p805_p10 = por %p804_p9, %p803_p8 }
 0x21d   :  { %p806_p11 = pnand %p805_p10, %p799_p7 }
 0x21f   :  { %809 = shalt.err (!%p806_p11)
}
 0x220   :  { %s810_s2 = scalar_lea.hbm %s1167_s12, 128 }
 0x221   :  { %p811_p12 = scmp.ne.s32.totalorder %s1167_s12, %s810_s2  ;;  %p814_p13 = scmp.lt.u32.totalorder %s810_s2, %s1167_s12 }
 0x223   :  { %p816_p0 = pnand %p814_p13, %p811_p12 }
 0x225   :  { %819 = shalt.err (!%p816_p0)
}
 0x226   :  { %629 = dma.vmem_to_hbm [thread:$0]  %s627_s26, 128, %s1167_s12, [#allocation7]  }
 0x227   :  { %834 = dma.done.wait [#allocation7], 128  }
 0x228   :  { %835 = vsyncadd [#allocation7], 4294967168 }
 0x229   :  { %633 = vsyncpa [#allocation7], 1 }

</bundles_post_ra>
